<compile_context>
chip_gen: v7x
topology: tpu7x:2x2x1
jax: 0.10.0
libtpu: 0.0.40
codegen_flags: <defaults>
</compile_context>

<pallas_src>
import functools

import jax
import jax.numpy as jnp
from jax import lax
from jax.experimental import pallas as pl
from jax.experimental.pallas import tpu as pltpu


def get_padding(kernel_size, dilation=1):
    return int((kernel_size * dilation - dilation) / 2)


def weight_norm_apply(v, g):
    """PyTorch weight_norm (dim=0): w[o] = g[o] * v[o] / ||v[o]||_2."""
    norm = jnp.sqrt(jnp.sum(v * v, axis=(1, 2), keepdims=True))
    return g.reshape(-1, 1, 1) * v / norm


def _fused_resblock_kernel(x_ref, lh_ref, rh_ref, w_ref, b_ref, o_ref,
                           *, C, K, dilations, pads, L_valid):
    """Fused ResBlock2 on one (batch, L-tile) block.

    x_ref : (1, C, LT)        f32 activation tile
    lh_ref: (1, 1, C, P)      left halo  (P = sum of per-conv paddings)
    rh_ref: (1, 1, C, P)      right halo
    w_ref : (D, C, K*C)       bf16 weights, lane-dense, [o, k*C + i] = w[o, i, k]
    b_ref : (D, C, 1)         f32 biases
    o_ref : (1, C, LT)        output tile
    """
    LT = x_ref.shape[-1]
    s = pl.program_id(1) * LT                 # global start column of this tile

    x_tile = x_ref[0]                         # (C, LT)
    left = lh_ref[0, 0]                       # (C, P)
    right = rh_ref[0, 0]                      # (C, P)
    cur = jnp.concatenate([left, x_tile, right], axis=1).astype(jnp.float32)

    r = sum(pads)                             # remaining halo on each side
    for idx, (d, p) in enumerate(zip(dilations, pads)):
        width = cur.shape[1]
        w_out = width - 2 * p

        # leaky_relu(0.1) in f32 on the VPU; zero out columns whose global
        # index is outside [0, L_valid) so the conv sees the same zero padding
        # F.conv1d applies to the full-length (post-activation) signal.
        gcol = s - r + lax.broadcasted_iota(jnp.int32, (C, width), 1)
        act = jnp.where(cur > 0, cur, jnp.float32(0.1) * cur)
        act = jnp.where((gcol >= 0) & (gcol < L_valid), act, 0.0)
        act = act.astype(jnp.bfloat16)

        # Collapse the K taps into one MXU matmul: (C, K*C) x (K*C, w_out).
        stacked = jnp.concatenate(
            [act[:, k * d: k * d + w_out] for k in range(K)], axis=0)
        conv = jnp.dot(w_ref[idx], stacked, preferred_element_type=jnp.float32)

        # Residual (center slice of the current window) + bias, all f32.
        cur = cur[:, p: p + w_out] + conv + b_ref[idx]
        r -= p

    o_ref[0] = cur.astype(o_ref.dtype)


def resblock2_forward(x, params, *, kernel_size=3, dilations=(1, 3),
                      l_tile_target=2048):
    """Pallas implementation of ResBlock2.forward.  x: (N, C, L)."""
    N, C, L = x.shape
    K = kernel_size
    assert K % 2 == 1, "only odd kernel sizes give symmetric 'same' padding"
    dilations = tuple(dilations)
    D = len(dilations)
    pads = tuple(get_padding(K, d) for d in dilations)
    P = sum(pads)
    assert P >= 1

    # Weight-norm reparam + lane-dense (C, K*C) re-layout; bf16 MXU operands.
    w2d, b2d = [], []
    for (v, g, b) in params:
        w = weight_norm_apply(v, g)                                 # (C, C, K)
        w2d.append(jnp.transpose(w, (0, 2, 1)).reshape(C, K * C))   # [o, k*C+i]
        b2d.append(b.reshape(C, 1))
    w_all = jnp.stack(w2d).astype(jnp.bfloat16)                     # (D, C, K*C)
    b_all = jnp.stack(b2d).astype(jnp.float32)                      # (D, C, 1)

    # L tiling: single full-L tile when small, otherwise 128-multiple tiles
    # sized to stay well inside v7x's 64 MiB VMEM even at C=512.
    if L <= l_tile_target:
        LT = L
    else:
        LT = max(128, (l_tile_target // 128) * 128)
    Lw = pl.cdiv(L, LT) * LT
    nt = Lw // LT
    assert P <= LT
    xw = x if Lw == L else jnp.pad(x, ((0, 0), (0, 0), (0, Lw - L)))

    # Tiny per-tile halos (P columns per side), built once in the wrapper so
    # every BlockSpec stays blocked/aligned and auto-pipelined.
    zeros_h = jnp.zeros((N, C, P), xw.dtype)
    left = jnp.stack(
        [zeros_h if j == 0 else xw[:, :, j * LT - P: j * LT]
         for j in range(nt)], axis=1)                               # (N, nt, C, P)
    right = jnp.stack(
        [zeros_h if j == nt - 1 else xw[:, :, (j + 1) * LT: (j + 1) * LT + P]
         for j in range(nt)], axis=1)                               # (N, nt, C, P)

    kernel = functools.partial(
        _fused_resblock_kernel, C=C, K=K, dilations=dilations, pads=pads,
        L_valid=L)

    itemsize = x.dtype.itemsize
    cost = pl.CostEstimate(
        flops=2 * N * Lw * C * C * K * D,
        transcendentals=0,
        bytes_accessed=(2 * N * C * Lw) * itemsize
        + int(w_all.size) * 2 + 2 * int(left.size) * itemsize)

    out = pl.pallas_call(
        kernel,
        out_shape=jax.ShapeDtypeStruct((N, C, Lw), x.dtype),
        grid_spec=pltpu.PrefetchScalarGridSpec(
            num_scalar_prefetch=0,
            grid=(N, nt),
            in_specs=[
                pl.BlockSpec((1, C, LT), lambda b, j: (b, 0, j)),      # x tile
                pl.BlockSpec((1, 1, C, P), lambda b, j: (b, j, 0, 0)),  # L halo
                pl.BlockSpec((1, 1, C, P), lambda b, j: (b, j, 0, 0)),  # R halo
                pl.BlockSpec((D, C, K * C), lambda b, j: (0, 0, 0)),    # weights
                pl.BlockSpec((D, C, 1), lambda b, j: (0, 0, 0)),        # biases
            ],
            out_specs=pl.BlockSpec((1, C, LT), lambda b, j: (b, 0, j)),
        ),
        compiler_params=pltpu.CompilerParams(
            dimension_semantics=("parallel", "parallel"),
            vmem_limit_bytes=48 * 1024 * 1024,   # < v7x 64 MiB physical
        ),
        cost_estimate=cost,
    )(xw, left, right, w_all, b_all)

    return out if Lw == L else out[:, :, :L]


def resblock2_reference(x, params, *, kernel_size=3, dilations=(1, 3)):
    """Pure-JAX f32 reference using lax.conv_general_dilated (matches F.conv1d)."""
    for d, (v, g, b) in zip(dilations, params):
        w = weight_norm_apply(v, g)
        pad = get_padding(kernel_size, d)
        xt = jnp.where(x > 0, x, 0.1 * x)
        y = lax.conv_general_dilated(
            xt, w,
            window_strides=(1,),
            padding=[(pad, pad)],
            rhs_dilation=(d,),
            dimension_numbers=("NCH", "OIH", "NCH"),
        ) + b.reshape(1, -1, 1)
        x = x + y
    return x


def make_params(key, channels, kernel_size, dilations):
    params = []
    for _ in dilations:
        kv, kg, kb, key = jax.random.split(key, 4)
        v = jax.random.normal(kv, (channels, channels, kernel_size), jnp.float32) * 0.2
        g = jnp.sqrt(jnp.sum(v * v, axis=(1, 2))) * (
            1.0 + 0.1 * jax.random.normal(kg, (channels,), jnp.float32)
        )
        b = jax.random.normal(kb, (channels,), jnp.float32) * 0.1
        params.append((v, g, b))
    return params


if __name__ == "__main__":
    key = jax.random.PRNGKey(0)
    kx, kp = jax.random.split(key)

    N, C, L = 2, 4, 16           # batch, channels, sequence length
    kernel_size = 3
    dilations = (1, 3)

    x = jax.random.normal(kx, (N, C, L), jnp.float32)
    params = make_params(kp, C, kernel_size, dilations)

    out = resblock2_forward(x, params, kernel_size=kernel_size, dilations=dilations)
    out = jax.block_until_ready(out)

    ref = resblock2_reference(x, params, kernel_size=kernel_size, dilations=dilations)
    assert out.shape == (N, C, L)
    # bf16 MXU operands vs. the f32 reference -> loosened tolerance.
    assert jnp.allclose(out, ref, atol=5e-2, rtol=5e-2), "mismatch vs reference"

    print("KERNEL_OK")
</pallas_src>

<mosaic_0001>
module attributes {stable_mosaic.version = 11 : i64} {
  func.func @_fused_resblock_kernel(%arg0: i32, %arg1: i32, %arg2: memref<1x4x16xf32, #tpu.memory_space<vmem>>, %arg3: memref<1x1x4x4xf32, #tpu.memory_space<vmem>>, %arg4: memref<1x1x4x4xf32, #tpu.memory_space<vmem>>, %arg5: memref<2x4x12xbf16, #tpu.memory_space<vmem>>, %arg6: memref<2x4x1xf32, #tpu.memory_space<vmem>>, %arg7: memref<1x4x16xf32, #tpu.memory_space<vmem>>) attributes {dimension_semantics = [#tpu.dimension_semantics<parallel>, #tpu.dimension_semantics<parallel>], iteration_bounds = array<i64: 2, 1>, scalar_prefetch = 0 : i64, scratch_operands = 0 : i64, tpu.core_type = #tpu.core_type<tc>, window_params = [{transform_indices = @transform_0, window_bounds = array<i64: 1, 4, 16>}, {transform_indices = @transform_1, window_bounds = array<i64: 1, 1, 4, 4>}, {transform_indices = @transform_2, window_bounds = array<i64: 1, 1, 4, 4>}, {pipeline_mode = #tpu.pipeline_mode<synchronous>, transform_indices = @transform_3, window_bounds = array<i64: 2, 4, 12>}, {pipeline_mode = #tpu.pipeline_mode<synchronous>, transform_indices = @transform_4, window_bounds = array<i64: 2, 4, 1>}, {transform_indices = @transform_5, window_bounds = array<i64: 1, 4, 16>}]} {
    %c16_i32 = arith.constant 16 : i32
    %0 = arith.muli %arg1, %c16_i32 : i32
    %c0 = arith.constant 0 : index
    %c0_0 = arith.constant 0 : index
    %c0_1 = arith.constant 0 : index
    %1 = vector.load %arg2[%c0, %c0_0, %c0_1] : memref<1x4x16xf32, #tpu.memory_space<vmem>>, vector<1x4x16xf32>
    %2 = vector.shape_cast %1 : vector<1x4x16xf32> to vector<4x16xf32>
    %c0_2 = arith.constant 0 : index
    %c0_3 = arith.constant 0 : index
    %c0_4 = arith.constant 0 : index
    %c0_5 = arith.constant 0 : index
    %3 = vector.load %arg3[%c0_2, %c0_3, %c0_4, %c0_5] : memref<1x1x4x4xf32, #tpu.memory_space<vmem>>, vector<1x1x4x4xf32>
    %4 = vector.shape_cast %3 : vector<1x1x4x4xf32> to vector<4x4xf32>
    %c0_6 = arith.constant 0 : index
    %c0_7 = arith.constant 0 : index
    %c0_8 = arith.constant 0 : index
    %c0_9 = arith.constant 0 : index
    %5 = vector.load %arg4[%c0_6, %c0_7, %c0_8, %c0_9] : memref<1x1x4x4xf32, #tpu.memory_space<vmem>>, vector<1x1x4x4xf32>
    %6 = vector.shape_cast %5 : vector<1x1x4x4xf32> to vector<4x4xf32>
    %7 = tpu.concatenate %4, %2, %6 in 1 : vector<4x4xf32>, vector<4x16xf32>, vector<4x4xf32> -> vector<4x24xf32>
    %c4_i32 = arith.constant 4 : i32
    %8 = arith.subi %0, %c4_i32 : i32
    %9 = tpu.iota {dimensions = array<i32: 1>} : vector<4x24xi32>
    %10 = vector.broadcast %8 : i32 to vector<4x24xi32>
    %11 = arith.addi %10, %9 : vector<4x24xi32>
    %cst = arith.constant 0.000000e+00 : f32
    %12 = vector.broadcast %cst : f32 to vector<4x24xf32>
    %13 = arith.cmpf ogt, %7, %12 : vector<4x24xf32>
    %cst_10 = arith.constant 1.000000e-01 : f32
    %14 = vector.broadcast %cst_10 : f32 to vector<4x24xf32>
    %15 = arith.mulf %14, %7 : vector<4x24xf32>
    %16 = arith.select %13, %7, %15 : vector<4x24xi1>, vector<4x24xf32>
    %c0_i32 = arith.constant 0 : i32
    %17 = vector.broadcast %c0_i32 : i32 to vector<4x24xi32>
    %18 = arith.cmpi sge, %11, %17 : vector<4x24xi32>
    %c16_i32_11 = arith.constant 16 : i32
    %19 = vector.broadcast %c16_i32_11 : i32 to vector<4x24xi32>
    %20 = arith.cmpi slt, %11, %19 : vector<4x24xi32>
    %21 = arith.andi %18, %20 : vector<4x24xi1>
    %cst_12 = arith.constant 0.000000e+00 : f32
    %22 = vector.broadcast %cst_12 : f32 to vector<4x24xf32>
    %23 = arith.select %21, %16, %22 : vector<4x24xi1>, vector<4x24xf32>
    %24 = arith.truncf %23 : vector<4x24xf32> to vector<4x24xbf16>
    %25 = vector.extract_strided_slice %24 {offsets = [0, 0], sizes = [4, 22], strides = [1, 1]} : vector<4x24xbf16> to vector<4x22xbf16>
    %26 = vector.extract_strided_slice %24 {offsets = [0, 1], sizes = [4, 22], strides = [1, 1]} : vector<4x24xbf16> to vector<4x22xbf16>
    %27 = vector.extract_strided_slice %24 {offsets = [0, 2], sizes = [4, 22], strides = [1, 1]} : vector<4x24xbf16> to vector<4x22xbf16>
    %28 = tpu.concatenate %25, %26, %27 in 0 : vector<4x22xbf16>, vector<4x22xbf16>, vector<4x22xbf16> -> vector<12x22xbf16>
    %c0_13 = arith.constant 0 : index
    %c0_14 = arith.constant 0 : index
    %c0_15 = arith.constant 0 : index
    %29 = vector.load %arg5[%c0_13, %c0_14, %c0_15] : memref<2x4x12xbf16, #tpu.memory_space<vmem>>, vector<1x4x12xbf16>
    %30 = vector.shape_cast %29 : vector<1x4x12xbf16> to vector<4x12xbf16>
    %cst_16 = arith.constant dense<0.000000e+00> : vector<4x22xf32>
    %31 = tpu.matmul %30, %28, %cst_16 {dimension_numbers = #tpu.dot_dimension_numbers<[1], [0], [0], [1], [0, 0, 1, 1], [], []>} : vector<4x12xbf16>, vector<12x22xbf16>, vector<4x22xf32> -> vector<4x22xf32>
    %32 = vector.extract_strided_slice %7 {offsets = [0, 1], sizes = [4, 22], strides = [1, 1]} : vector<4x24xf32> to vector<4x22xf32>
    %33 = arith.addf %32, %31 : vector<4x22xf32>
    %c0_17 = arith.constant 0 : index
    %c0_18 = arith.constant 0 : index
    %c0_19 = arith.constant 0 : index
    %34 = vector.load %arg6[%c0_17, %c0_18, %c0_19] : memref<2x4x1xf32, #tpu.memory_space<vmem>>, vector<1x4x1xf32>
    %35 = vector.shape_cast %34 : vector<1x4x1xf32> to vector<4x1xf32>
    %36 = vector.broadcast %35 : vector<4x1xf32> to vector<4x22xf32>
    %37 = arith.addf %33, %36 : vector<4x22xf32>
    %c3_i32 = arith.constant 3 : i32
    %38 = arith.subi %0, %c3_i32 : i32
    %39 = tpu.iota {dimensions = array<i32: 1>} : vector<4x22xi32>
    %40 = vector.broadcast %38 : i32 to vector<4x22xi32>
    %41 = arith.addi %40, %39 : vector<4x22xi32>
    %cst_20 = arith.constant 0.000000e+00 : f32
    %42 = vector.broadcast %cst_20 : f32 to vector<4x22xf32>
    %43 = arith.cmpf ogt, %37, %42 : vector<4x22xf32>
    %cst_21 = arith.constant 1.000000e-01 : f32
    %44 = vector.broadcast %cst_21 : f32 to vector<4x22xf32>
    %45 = arith.mulf %44, %37 : vector<4x22xf32>
    %46 = arith.select %43, %37, %45 : vector<4x22xi1>, vector<4x22xf32>
    %c0_i32_22 = arith.constant 0 : i32
    %47 = vector.broadcast %c0_i32_22 : i32 to vector<4x22xi32>
    %48 = arith.cmpi sge, %41, %47 : vector<4x22xi32>
    %c16_i32_23 = arith.constant 16 : i32
    %49 = vector.broadcast %c16_i32_23 : i32 to vector<4x22xi32>
    %50 = arith.cmpi slt, %41, %49 : vector<4x22xi32>
    %51 = arith.andi %48, %50 : vector<4x22xi1>
    %cst_24 = arith.constant 0.000000e+00 : f32
    %52 = vector.broadcast %cst_24 : f32 to vector<4x22xf32>
    %53 = arith.select %51, %46, %52 : vector<4x22xi1>, vector<4x22xf32>
    %54 = arith.truncf %53 : vector<4x22xf32> to vector<4x22xbf16>
    %55 = vector.extract_strided_slice %54 {offsets = [0, 0], sizes = [4, 16], strides = [1, 1]} : vector<4x22xbf16> to vector<4x16xbf16>
    %56 = vector.extract_strided_slice %54 {offsets = [0, 3], sizes = [4, 16], strides = [1, 1]} : vector<4x22xbf16> to vector<4x16xbf16>
    %57 = vector.extract_strided_slice %54 {offsets = [0, 6], sizes = [4, 16], strides = [1, 1]} : vector<4x22xbf16> to vector<4x16xbf16>
    %58 = tpu.concatenate %55, %56, %57 in 0 : vector<4x16xbf16>, vector<4x16xbf16>, vector<4x16xbf16> -> vector<12x16xbf16>
    %c1 = arith.constant 1 : index
    %c0_25 = arith.constant 0 : index
    %c0_26 = arith.constant 0 : index
    %59 = vector.load %arg5[%c1, %c0_25, %c0_26] : memref<2x4x12xbf16, #tpu.memory_space<vmem>>, vector<1x4x12xbf16>
    %60 = vector.shape_cast %59 : vector<1x4x12xbf16> to vector<4x12xbf16>
    %cst_27 = arith.constant dense<0.000000e+00> : vector<4x16xf32>
    %61 = tpu.matmul %60, %58, %cst_27 {dimension_numbers = #tpu.dot_dimension_numbers<[1], [0], [0], [1], [0, 0, 1, 1], [], []>} : vector<4x12xbf16>, vector<12x16xbf16>, vector<4x16xf32> -> vector<4x16xf32>
    %62 = vector.extract_strided_slice %37 {offsets = [0, 3], sizes = [4, 16], strides = [1, 1]} : vector<4x22xf32> to vector<4x16xf32>
    %63 = arith.addf %62, %61 : vector<4x16xf32>
    %c1_28 = arith.constant 1 : index
    %c0_29 = arith.constant 0 : index
    %c0_30 = arith.constant 0 : index
    %64 = vector.load %arg6[%c1_28, %c0_29, %c0_30] : memref<2x4x1xf32, #tpu.memory_space<vmem>>, vector<1x4x1xf32>
    %65 = vector.shape_cast %64 : vector<1x4x1xf32> to vector<4x1xf32>
    %66 = vector.broadcast %65 : vector<4x1xf32> to vector<4x16xf32>
    %67 = arith.addf %63, %66 : vector<4x16xf32>
    %c0_31 = arith.constant 0 : index
    %c0_32 = arith.constant 0 : index
    %c0_33 = arith.constant 0 : index
    %68 = vector.load %arg7[%c0_31, %c0_32, %c0_33] : memref<1x4x16xf32, #tpu.memory_space<vmem>>, vector<1x4x16xf32>
    %69 = vector.shape_cast %68 : vector<1x4x16xf32> to vector<4x16xf32>
    %70 = vector.shape_cast %67 : vector<4x16xf32> to vector<1x4x16xf32>
    tpu.vector_store %arg7[%c0_31, %c0_32, %c0_33], %70 {strides = array<i32>} : memref<1x4x16xf32, #tpu.memory_space<vmem>>, vector<1x4x16xf32>,
    return
  }
  func.func @transform_0(%arg0: i32, %arg1: i32) -> (i32, i32, i32) {
    %c0_i32 = arith.constant 0 : i32
    %c0_i32_0 = arith.constant 0 : i32
    return %arg0, %c0_i32, %arg1 : i32, i32, i32
  }
  func.func @transform_1(%arg0: i32, %arg1: i32) -> (i32, i32, i32, i32) {
    %c0_i32 = arith.constant 0 : i32
    %c0_i32_0 = arith.constant 0 : i32
    %c0_i32_1 = arith.constant 0 : i32
    return %arg0, %arg1, %c0_i32, %c0_i32_0 : i32, i32, i32, i32
  }
  func.func @transform_2(%arg0: i32, %arg1: i32) -> (i32, i32, i32, i32) {
    %c0_i32 = arith.constant 0 : i32
    %c0_i32_0 = arith.constant 0 : i32
    %c0_i32_1 = arith.constant 0 : i32
    return %arg0, %arg1, %c0_i32, %c0_i32_0 : i32, i32, i32, i32
  }
  func.func @transform_3(%arg0: i32, %arg1: i32) -> (i32, i32, i32) {
    %c0_i32 = arith.constant 0 : i32
    %c0_i32_0 = arith.constant 0 : i32
    %c0_i32_1 = arith.constant 0 : i32
    %c0_i32_2 = arith.constant 0 : i32
    return %c0_i32, %c0_i32_0, %c0_i32_1 : i32, i32, i32
  }
  func.func @transform_4(%arg0: i32, %arg1: i32) -> (i32, i32, i32) {
    %c0_i32 = arith.constant 0 : i32
    %c0_i32_0 = arith.constant 0 : i32
    %c0_i32_1 = arith.constant 0 : i32
    %c0_i32_2 = arith.constant 0 : i32
    return %c0_i32, %c0_i32_0, %c0_i32_1 : i32, i32, i32
  }
  func.func @transform_5(%arg0: i32, %arg1: i32) -> (i32, i32, i32) {
    %c0_i32 = arith.constant 0 : i32
    %c0_i32_0 = arith.constant 0 : i32
    return %arg0, %c0_i32, %arg1 : i32, i32, i32
  }
}

</mosaic_0001>

<bundles_post_ra>
// kernel: tpu_custom_call.1
= control target key start
LH: loop header
LB: loop body
LE: loop exit
PB: predicated region body
PF: predicated region fallthrough
CT: control target
= control target key end

     0   :  { %10 = vsyncpa [#allocation3], 0  ;;  %s1107_s0 = inlined_call_operand.vmem [shape: f32[2,4,16], index: 0, kind: input, shape index: {}]   ;;  %s1108_s1 = inlined_call_operand.hbm [shape: f32[2,1,4,4], index: 1, kind: input, shape index: {}]   ;;  %s1109_s2 = inlined_call_operand.vmem [shape: f32[2,1,4,4], index: 2, kind: input, shape index: {}]   ;;  %s1110_s3 = inlined_call_operand.vmem [shape: bf16[2,4,12], index: 3, kind: input, shape index: {}]   ;;  %s1111_s4 = inlined_call_operand.vmem [shape: f32[2,4,1], index: 4, kind: input, shape index: {}]   ;;  %s1112_s5 = inlined_call_operand.hbm [shape: f32[2,4,16], index: 5, kind: output, shape index: {}]  }
   0x1   :  { %12 = vsyncpa [#allocation3 + $0x1], 0 }
   0x2   :  { %13 = vsyncpa [#allocation4], 0 }
   0x3   :  { %15 = vsyncpa [#allocation4 + $0x1], 0  ;;  %s901_s18 = smov 0   ;;  %s903_s19 = smov 0  }
   0x4   :  { %s905_s20 = smov 0   ;;  %s907_s21 = smov 0  }
   0x5   :  { %s909_s22 = smov 0   ;;  %s911_s23 = smov 0  }
   0x6 LB: > { %s635_s24 = sadd.s32 4294967295, %s856_s23   ;;  %s636_s25 = sadd.s32 4294967294, %s856_s23   ;;  %s856_s23 = sphi %s911_s23, %s21_s23   ;;  %s852_s22 = sphi %s909_s22, %s1128_s22   ;;  %s848_s21 = sphi %s907_s21, %s1127_s21   ;;  %s844_s20 = sphi %s905_s20, %s1126_s20   ;;  %s840_s19 = sphi %s903_s19, %s1125_s19   ;;  %s836_s18 = sphi %s901_s18, %s1124_s18  }
   0x7   : > { %s33_s26 = sadd.s32 1, %s852_s22  ;;  %s70_s27 = sadd.s32 1, %s844_s20 }
   0x8   : > { %p35_p0 = scmp.ge.s32.totalorder %s33_s26, 2  ;;  %p77_p1 = scmp.ne.s32.totalorder %s844_s20, %s840_s19 }
   0x9   : > { %p78_p2 = scmp.eq.s32.totalorder %s856_s23, 0  ;;  %p83_p3 = scmp.ne.s32.totalorder %s840_s19, %s836_s18 }
   0xa   : > { %s1130_s26 = smov (%p35_p0, %s33_s26), 0  ;;  %p84_p5 = scmp.eq.s32.totalorder %s635_s24, 0 }
   0xb   : > { %p942_p4 = por %p78_p2, %p77_p1  ;;  %s65_s29 = ssub.s32 %s852_s22, %s1130_s26 }
   0xc   : > { %p179_p6 = scmp.eq.s32.totalorder %s635_s24, 1  ;;  %p68_p7 = scmp.eq.s32.totalorder %s65_s29, 0 }
   0xd   : > { %p948_p8 = por %p84_p5, %p83_p3  ;;  %p185_p10 = scmp.eq.s32.totalorder %s636_s25, 1 }
   0xe   : > { %p952_p9 = por %p179_p6, %p77_p1  ;;  %p682_p13 = scmp.lt.s32.totalorder %s856_s23, 2 }
   0xf   : > { %s957_s7 = scalar_select %p68_p7, %s844_s20, %s70_s27  }
  0x10   : > { %s1116_s6 = scalar_select %p952_p9, 1, 0 }
  0x11   : > { %p959_p11 = por %p185_p10, %p83_p3  ;;  %s221_s9 = sand.u32 1, %s844_s20  }
  0x12   : > { %s639_s10 = sshll.u32 %s221_s9, 2  ;;  %s640_s11 = sshll.u32 %s852_s22, 6 }
  0x13   : > { %s1117_s8 = scalar_select %p959_p11, 1, 0 }
  0x14   : > { %s970_s14 = scalar_lea.hbm %s1108_s1, %s640_s11  ;;  %s225_s15 = scalar_lea.vmem [#allocation2], %s639_s10 }
  0x15   : > { %s233_s16 = sshll.u32 %s225_s15, 4  ;;  %p976_p0 = pnand %p682_p13, %p942_p4  ;;  %s972_s16 = int_to_ptr.vmem [resolvable:$true] %s233_s16 }
  0x16   : > { %s222_s24 = scalar_lea.sflag [#allocation3], %s221_s9  ;;  %s744_s25 = scalar_lea.hbm %s970_s14, 64 }
  0x17   : > { %p745_p3 = scmp.ne.s32.totalorder %s970_s14, %s744_s25  ;;  %p746_p5 = pneg %p976_p0 }
  0x18   : > { %s749_s28 = scalar_lea.hbm %s1108_s1, 128  ;;  %p750_p4 = scmp.lt.u32.totalorder %s970_s14, %s1108_s1 }
  0x19   : > { %p747_p6 = pnand %p746_p5, %p745_p3  ;;  %p751_p10 = scmp.lt.u32.totalorder %s749_s28, %s744_s25 }
  0x1a   : > { %p753_p12 = scmp.lt.u32.totalorder %s744_s25, %s970_s14 }
  0x1b   : > { %p748_p7 = pneg %p747_p6  ;;  %p752_p13 = por %p751_p10, %p750_p4 }
  0x1d   : > { %p754_p1 = por %p753_p12, %p752_p13 }
  0x1f   : > { %p755_p2 = pnand %p754_p1, %p748_p7 }
  0x21   : > { %758 = shalt.err (!%p755_p2)
}
  0x22   : > { %s759_s9 = scalar_lea.vmem %s972_s16, 64  ;;  %s858_s12 = smov [#allocation2]  }
  0x23   : > { %p760_p3 = scmp.ne.s32.totalorder %s972_s16, %s759_s9  ;;  %s764_s13 = sshll.u32 %s858_s12, 4  ;;  %s765_s13 = int_to_ptr.vmem [resolvable:$false] %s764_s13 }
  0x24   : > { %s766_s15 = scalar_lea.vmem %s765_s13, 128  ;;  %p767_p9 = scmp.lt.s32.totalorder %s972_s16, %s765_s13 }
  0x25   : > { %p762_p6 = pnand %p760_p3, %p746_p5  ;;  %p768_p4 = scmp.lt.s32.totalorder %s766_s15, %s759_s9 }
  0x27   : > { %p763_p11 = pneg %p762_p6  ;;  %p769_p10 = por %p768_p4, %p767_p9 }
  0x29   : > { %p770_p12 = pnand %p769_p10, %p763_p11 }
  0x2b   : > { %773 = shalt.err (!%p770_p12)
}
  0x2c   : > { %677 = dma.hbm_to_vmem [thread:$0]  (!%p976_p0), %s970_s14, 64, %s972_s16, %s222_s24  }
  0x2d   : > { %p1119_p1 = scmp.lt.s32.totalorder %s856_s23, 3  ;;  %p1120_p2 = scmp.ge.s32.totalorder %s856_s23, 1 }
  0x2f   : > { %p249_p5 = pnand %p1120_p2, %p1119_p1 }
  0x30   : > { %s1012_s25 = sand.u32 (!%p249_p5), 1, %s840_s19  }
  0x31   : > { %252 = sbr.rel (%p249_p5) target bundleno = 1351 (0x547), region = 40  ;;  %s642_s27 = sshll.u32 (!%p249_p5), %s1012_s25, 2 }
  0x32   : > { %s255_s29 = scalar_lea.sflag (!%p249_p5), [#allocation3], %s1012_s25  ;;  %s258_s17 = scalar_lea.vmem (!%p249_p5), [#allocation2], %s642_s27 }
  0x38   : > { %827 = dma.done.wait (%p948_p8), %s255_s29, 64  }
  0x39   : > { %829 = vsyncadd (%p948_p8), %s255_s29, 4294967232  ;;  %p299_p9 = scmp.lt.s32.totalorder %s848_s21, 1  ;;  %s859_s13 = smov 4   ;;  %v331_v2 = vlaneseq  ;;  %v316_v6 = vld [vmem:[%s258_s17] sm:$0xf]  ;;  %vm326_vm0 = vcmask 31744  }
  0x3a   : > { %s860_s30 = smov 20   ;;  %vm328_vm1 = vcmask 162816   ;;  %v861_v10 = vmov 0.0   ;;  %vm862_vm6 = vmmov 0   ;;  %v410_v15 = vld [vmem:[%s1111_s4] sm:$0xf] }
  0x3b   : > { %s300_s14 = scalar_select %p299_p9, %s848_s21, 1  ;;  %v332_v3 = vand.u32 127, %v331_v2  ;;  %658 = vmatprep.subr.bf16.mxu0 %v861_v10  ;;  %664 = vmatprep.subr.bf16.mxu1 %v861_v10  ;;  %v863_v16 = vmov 0   ;;  %vm350_vm7 = vcmask 1041408   ;;  %vm354_vm8 = vcmask 1043456  }
  0x3c   : > { %660 = vmatprep.mubr.msk.bf16.mxu0 %vm862_vm6, %v861_v10  ;;  %666 = vmatprep.mubr.msk.bf16.mxu1 %vm862_vm6, %v861_v10  ;;  %s864_s17 = smov 127   ;;  %vm362_vm9 = vcmask 1045504   ;;  %v357_v24 = vld [vmem:[%s1110_s3] sm:$0x3]  ;;  %vm358_vm10 = vcmask 97280   ;;  %s866_s28 = smov 1  }
  0x3d   : > { %s644_s16 = sshll.u32 %s300_s14, 2  ;;  %v334_v4 = vadd.s32 4294967292, %v332_v3  ;;  %743 = vset.pattern.permute.xlu0 %v863_v16  ;;  %s865_s14 = smov 126   ;;  %v419_v35 = vadd.s32 4294967293, %v332_v3  ;;  %v649_v41 = vld [vmem:[%s1111_s4 + $0x4] sm:$0xf] }
  0x3e   : > { %s305_s10 = scalar_lea.vmem %s1107_s0, %s644_s16  ;;  %s312_s12 = scalar_lea.vmem %s1109_s2, %s644_s16  ;;  %v647_v47 = vld [vmem:[%s1110_s3 + $0x2] sm:$0x3]  ;;  %vm508_vm15 = vcmask 125952  }
  0x3f   : > { %v315_v0 = vld [vmem:[%s305_s10] sm:$0xf]  ;;  %vm338_vm2 = vcmp.ge.s32.totalorder %v334_v4, 0  ;;  %vm339_vm3 = vcmp.lt.s32.totalorder %v334_v4, 16  ;;  %vm423_vm12 = vcmp.ge.s32.totalorder %v419_v35, 0  ;;  %vm424_vm13 = vcmp.lt.s32.totalorder %v419_v35, 16 }
  0x40   : > { %319 = vrot.lane.b32.xlu0 %v315_v0, %s859_s13  ;;  %v317_v1 = vld [vmem:[%s312_s12] sm:$0xf]  ;;  %vm340_vm5 = vmand %vm338_vm2, %vm339_vm3  ;;  %s867_s10 = smov 122   ;;  %s868_s11 = smov 125  }
  0x41   : > { %vm425_vm14 = vmand %vm423_vm12, %vm424_vm13  ;;  %s869_s29 = smov 124   ;;  %p1121_p11 = scmp.ne.s32.totalorder %s1116_s6, 0 }
  0x44   : > { %323 = vrot.lane.b32.xlu0 %v317_v1, %s860_s30 }
  0x48   : > { %413 = vperm.xlu0 %743, %v410_v15  }
  0xb2   : > { %v320_v5 = vpop.permute.xlu0 %319 }
  0xb3   : > { %v327_v7 = vsel %vm326_vm0, %v316_v6, %v320_v5 }
  0xb6   : > { %v324_v8 = vpop.permute.xlu0 %323 }
  0xb7   : > { %v329_v9 = vsel %vm328_vm1, %v327_v7, %v324_v8 }
  0xb8   : > { %vm335_vm4 = vcmp.gt.f32.partialorder %v329_v9, 0.0  ;;  %v336_v11 = vmul.f32 0.1, %v329_v9 }
  0xba   : > { %v337_v12 = vsel %vm335_vm4, %v329_v9, %v336_v11 }
  0xbb   : > { %v341_v13 = vsel %vm340_vm5, %v337_v12, 0.0 }
  0xbc   : > { %v342_v14 = vpack.c.bf16 %v341_v13, %v341_v13 }
  0xbe   : > { %v344_v17 = vrot.slane %v342_v14, 6  ;;  %v347_v18 = vrot.slane %v342_v14, 4 }
  0xc0   : > { %345 = vrot.lane.b32.xlu1 %v344_v17, %s864_s17 }
  0xc4   : > { %348 = vrot.lane.b32.xlu1 %v347_v18, %s865_s14  ;;  %s298_s14 = scalar_lea.vmem [#allocation5], %s642_s27 }
  0xc5   : > { %s525_s16 = sshll.u32 %s298_s14, 4  ;;  %s1060_s16 = int_to_ptr.vmem [resolvable:$true] %s525_s16 }
  0xc7   : > { %v414_v30 = vpop.permute.xlu0 %413 }
 0x132   : > { %v346_v19 = vpop.permute.xlu1 %345 }
 0x133   : > { %v353_v20 = vsel %vm350_vm7, %v342_v14, %v346_v19 }
 0x136   : > { %v349_v21 = vpop.permute.xlu1 %348 }
 0x137   : > { %v356_v22 = vsel %vm354_vm8, %v353_v20, %v349_v21 }
 0x138   : > { %v363_v23 = vsel %vm362_vm9, %v356_v22, 0 }
 0x139   : > { %659 = vmatpush3.bf16.msra.mxu0 %v363_v23 }
 0x13c   : > { %661 = vmatmul.mubr.msk.bf16.vlgmr.msra.gmra.mrb[0].mxu0 %vm358_vm10, %v357_v24 }
 0x20f   : > { %v399_v25 = vpop.f32.mrb[0].mxu0 }
 0x210   : > { %406 = vrot.lane.b32.xlu1 %v399_v25, %s866_s28  ;;  %v662_v26 = vpop.f32.mrb[1].mxu0 }
 0x211   : > { %v402_v27 = vpop.f32.mrb[2].mxu0 }
 0x212   : > { %v663_v28 = vpop.f32.mrb[3].mxu0 }
 0x282   : > { %v407_v29 = vpop.permute.xlu1 %406 }
 0x283   : > { %v409_v31 = vadd.f32 %v407_v29, %v329_v9 }
 0x285   : > { %v416_v32 = vadd.f32 %v414_v30, %v409_v31 }
 0x287   : > { %vm420_vm11 = vcmp.gt.f32.partialorder %v416_v32, 0.0  ;;  %v421_v33 = vmul.f32 0.1, %v416_v32 }
 0x289   : > { %v422_v34 = vsel %vm420_vm11, %v416_v32, %v421_v33 }
 0x28a   : > { %427 = vrot.lane.b32.xlu1 %v422_v34, %s864_s17  ;;  %s651_s17 = sshll.u32 %s848_s21, 6  ;;  %s870_s21 = smov [#allocation5]  }
 0x28b   : > { %s778_s27 = sshll.u32 %s870_s21, 4  ;;  %s779_s27 = int_to_ptr.vmem [resolvable:$false] %s778_s27 }
 0x28c   : > { %s780_s9 = scalar_lea.vmem %s779_s27, 128  ;;  %p781_p13 = scmp.lt.s32.totalorder %s1060_s16, %s779_s27 }
 0x2fc   : > { %v428_v36 = vpop.permute.xlu1 %427 }
 0x2fd   : > { %v430_v37 = vsel %vm425_vm14, %v428_v36, 0.0 }
 0x2fe   : > { %v431_v38 = vpack.c.bf16 %v430_v37, %v430_v37 }
 0x300   : > { %v436_v39 = vrot.slane %v431_v38, 4  ;;  %v433_v40 = vrot.slane %v431_v38, 6 }
 0x302   : > { %437 = vrot.lane.b32.xlu1 %v436_v39, %s867_s10  ;;  %434 = vrot.lane.b32.xlu0 %v433_v40, %s868_s11  ;;  %s511_s10 = scalar_lea.sflag [#allocation4], %s1012_s25  ;;  %s774_s11 = scalar_lea.vmem %s1060_s16, 64 }
 0x303   : > { %p775_p8 = scmp.ne.s32.totalorder %s1060_s16, %s774_s11  ;;  %p782_p3 = scmp.lt.s32.totalorder %s780_s9, %s774_s11 }
 0x305   : > { %p776_p0 = pnand %p775_p8, %p1121_p11  ;;  %p783_p6 = por %p782_p3, %p781_p13 }
 0x306   : > { %500 = vperm.xlu0 %743, %v649_v41  }
 0x307   : > { %p777_p7 = pneg %p776_p0 }
 0x309   : > { %p784_p4 = pnand %p783_p6, %p777_p7 }
 0x374   : > { %v438_v42 = vpop.permute.xlu1 %437  ;;  %v435_v43 = vpop.permute.xlu0 %434 }
 0x375   : > { %v441_v44 = vsel %vm350_vm7, %v431_v38, %v435_v43 }
 0x376   : > { %v443_v45 = vsel %vm354_vm8, %v441_v44, %v438_v42 }
 0x377   : > { %v449_v46 = vsel %vm362_vm9, %v443_v45, 0 }
 0x378   : > { %665 = vmatpush3.bf16.msra.mxu1 %v449_v46 }
 0x37b   : > { %667 = vmatmul.mubr.msk.bf16.vlgmr.msra.gmra.mrb[0].mxu1 %vm358_vm10, %v647_v47 }
 0x385   : > { %v501_v54 = vpop.permute.xlu0 %500 }
 0x44e   : > { %v485_v48 = vpop.f32.mrb[0].mxu1 }
 0x44f   : > { %492 = vrot.lane.b32.xlu1 %v485_v48, %s859_s13  ;;  %v668_v49 = vpop.f32.mrb[1].mxu1  ;;  %s1058_s13 = scalar_lea.hbm %s1112_s5, %s651_s17 }
 0x450   : > { %v488_v50 = vpop.f32.mrb[2].mxu1 }
 0x451   : > { %v669_v51 = vpop.f32.mrb[3].mxu1 }
 0x4c1   : > { %v493_v52 = vpop.permute.xlu1 %492 }
 0x4c2   : > { %v495_v53 = vadd.f32 %v493_v52, %v416_v32 }
 0x4c4   : > { %v503_v55 = vadd.f32 %v501_v54, %v495_v53 }
 0x4c6   : > { %505 = vrot.lane.b32.xlu0 %v503_v55, %s869_s29 }
 0x538   : > { %v506_v56 = vpop.permute.xlu0 %505 }
 0x539   : > { %509 = vst.msk [vmem:[%s298_s14] sm:$0xf] %vm508_vm15, %v506_v56 }
 0x53a   : > { %787 = shalt.err (!%p784_p4)
}
 0x53b   : > { %s788_s25 = scalar_lea.hbm %s1058_s13, 64  ;;  %s792_s15 = scalar_lea.hbm %s1112_s5, 128 }
 0x53c   : > { %p789_p10 = scmp.ne.s32.totalorder %s1058_s13, %s788_s25  ;;  %p793_p2 = scmp.lt.u32.totalorder %s1058_s13, %s1112_s5 }
 0x53d   : > { %p794_p5 = scmp.lt.u32.totalorder %s792_s15, %s788_s25  ;;  %p796_p8 = scmp.lt.u32.totalorder %s788_s25, %s1058_s13 }
 0x53e   : > { %p790_p12 = pnand %p789_p10, %p1121_p11 }
 0x53f   : > { %p795_p9 = por %p794_p5, %p793_p2 }
 0x540   : > { %p791_p1 = pneg %p790_p12 }
 0x541   : > { %p797_p0 = por %p796_p8, %p795_p9 }
 0x543   : > { %p798_p7 = pnand %p797_p0, %p791_p1 }
 0x545   : > { %801 = shalt.err (!%p798_p7)
}
 0x546   : > { %672 = dma.vmem_to_hbm [thread:$0]  (%p1121_p11), %s1060_s16, 64, %s1058_s13, %s511_s10  }
 0x547 PF: > { %s537_s14 = sand.u32 1, %s836_s18   ;;  %p1122_p13 = scmp.ne.s32.totalorder %s1117_s8, 0 }
 0x548   : > { %p1123_p3 = scmp.ge.s32.totalorder %s856_s23, 2  ;;  %s538_s24 = scalar_lea.sflag [#allocation4], %s537_s14 }
 0x54a   : > { %p679_p6 = pnand %p1123_p3, %p1122_p13 }
 0x54c   : > { %831 = dma.done.wait (!%p679_p6), %s538_s24, 64  }
 0x54d   : > { %833 = vsyncadd (!%p679_p6), %s538_s24, 4294967232  ;;  %s21_s23 = sadd.s32 1, %s856_s23   ;;  %s1124_s18 = smov %s840_s19 }
 0x54e   : > { %p18_p4 = scmp.ge.s32.totalorder %s21_s23, 4   ;;  %s1125_s19 = smov %s844_s20 }
 0x54f   : > { %s1126_s20 = smov %s957_s7  ;;  %s1127_s21 = smov %s852_s22 }
 0x550   : > { %s1128_s22 = smov %s1130_s26  ;;  %20 = sbr.rel (!%p18_p4) target bundleno = 6 (0x6), region = 93 }
 0x557   :  { %543 = vsyncpa [#allocation3], 1 }
 0x558   :  { %545 = vsyncpa [#allocation3 + $0x1], 1 }
 0x559   :  { %546 = vsyncpa [#allocation4], 1 }
 0x55a   :  { %548 = vsyncpa [#allocation4 + $0x1], 1 }

</bundles_post_ra>
